<compile_context>
chip_gen: v7x
topology: tpu7x:2x2x1
jax: 0.10.0
libtpu: 0.0.40
codegen_flags: <defaults>
</compile_context>

<pallas_src>
import functools

import jax
import jax.numpy as jnp
from jax.experimental import pallas as pl
from jax.experimental.pallas import tpu as pltpu

LOG_STD_MIN = -5.0
LOG_STD_MAX = 2.0
_LS_SCALE = 0.5 * (LOG_STD_MAX - LOG_STD_MIN)      # 3.5
_LS_SHIFT = LOG_STD_MIN + _LS_SCALE                # -1.5  (log_std = scale*t + shift)


def _round_up(x, m):
    return ((x + m - 1) // m) * m


def _vmem_estimate(tile_b, obs_dim, h_dim, a_dim, in_bytes):
    """Rough VMEM footprint (pipeline buffers + live temporaries), in bytes."""
    sub = 16 if in_bytes == 2 else 8
    lane = 128
    # Streamed obs tile (double-buffered) + streamed out tile (double-buffered).
    stream = (2 * _round_up(obs_dim, sub) * tile_b * in_bytes
              + 2 * _round_up(3 * a_dim, 8) * tile_b * 4)
    # Resident weights (single-buffered via pl.Buffered(1)) + biases.
    wts = (_round_up(h_dim, sub) * _round_up(obs_dim, lane)
           + _round_up(h_dim, sub) * _round_up(h_dim, lane)
           + _round_up(2 * a_dim, sub) * _round_up(h_dim, lane)) * in_bytes
    wts += (2 * _round_up(h_dim, 8) + _round_up(2 * a_dim, 8)) * lane * 4
    # Live activations in the body (h in f32 + compute dtype, heads/th/std/out).
    temps = (3 * _round_up(h_dim, 8) + 4 * _round_up(2 * a_dim, 8)) * tile_b * 4
    return stream + wts + temps


def _actor_kernel(obs_ref, w1_ref, b1_ref, w2_ref, b2_ref, wh_ref, bh_ref,
                  out_ref, *, a_dim, compute_dtype):
    """Trunk (Linear->ReLU->Linear->ReLU->fused heads), batch on the lane axis."""
    x = obs_ref[...]                                               # (obs_dim, Tb)

    h = jnp.dot(w1_ref[...], x, preferred_element_type=jnp.float32) + b1_ref[...]
    h = jnp.maximum(h, 0.0).astype(compute_dtype)                  # (H, Tb)
    h = jnp.dot(w2_ref[...], h, preferred_element_type=jnp.float32) + b2_ref[...]
    h = jnp.maximum(h, 0.0).astype(compute_dtype)                  # (H, Tb)

    # Fused heads: rows [:A] = mu, rows [A:] = raw log_std.        (2A, Tb) f32
    heads = jnp.dot(wh_ref[...], h, preferred_element_type=jnp.float32) + bh_ref[...]

    th = jnp.tanh(heads)                  # one EUP pass, reused for both halves
    mu = heads[:a_dim, :]
    std = jnp.exp(_LS_SCALE * th[a_dim:, :] + _LS_SHIFT)           # folded affine

    # Single lane-dense store of the (3A, Tb) slab: [mu ; std ; tanh(mu)].
    out_ref[...] = jnp.concatenate([mu, std, th[:a_dim, :]], axis=0)


def diag_gaussian_actor(obs, params, *, tile_b=4096, param_dtype=jnp.float32,
                        vmem_budget_bytes=40 << 20,
                        dimension_semantics=("parallel",)):
    """DiagGaussianActor forward in a single Pallas kernel.

    params are in torch Linear layout: w (out, in), b (out, 1).
    Returns (mu, std, squashed_mean) -- the SquashedNormal(mu, std) parameters
    and its mean tanh(mu), each of shape (batch, action_dim), f32.
    """
    w1, b1, w2, b2, wh, bh = params
    B, obs_dim = obs.shape
    H = w1.shape[0]
    A = wh.shape[0] // 2
    in_bytes = jnp.dtype(param_dtype).itemsize

    # Batch tile: as large as the VMEM budget allows (lane-aligned); whole
    # padded batch in one grid step when it fits.
    tile_b = max(128, _round_up(min(tile_b, _round_up(B, 128)), 128))
    while tile_b > 128 and _vmem_estimate(tile_b, obs_dim, H, A, in_bytes) > vmem_budget_bytes:
        tile_b = max(128, _round_up(tile_b // 2, 128))
    n_tiles = pl.cdiv(B, tile_b)
    Bp = n_tiles * tile_b

    est = _vmem_estimate(tile_b, obs_dim, H, A, in_bytes)
    vmem_limit = int(min(max(est + (16 << 20), 32 << 20), 110 << 20))

    # Streamed input with batch on the lane axis.
    obs_t = obs.astype(param_dtype).T                              # (obs_dim, B)
    if Bp != B:
        obs_t = jnp.pad(obs_t, ((0, 0), (0, Bp - B)))

    # Matmul inputs may be bf16; biases / accumulation / elementwise stay f32.
    w1c = w1.astype(param_dtype)
    w2c = w2.astype(param_dtype)
    whc = wh.astype(param_dtype)

    kernel = functools.partial(_actor_kernel, a_dim=A, compute_dtype=param_dtype)

    # Resident operands: constant index_map, single buffer.
    resident = lambda arr: pl.BlockSpec(arr.shape, lambda i: (0, 0),
                                        pipeline_mode=pl.Buffered(1))

    out_t = pl.pallas_call(
        kernel,
        out_shape=jax.ShapeDtypeStruct((3 * A, Bp), jnp.float32),
        grid=(n_tiles,),
        in_specs=[
            pl.BlockSpec((obs_dim, tile_b), lambda i: (0, i)),     # streamed obs tile
            resident(w1c), resident(b1),
            resident(w2c), resident(b2),
            resident(whc), resident(bh),
        ],
        out_specs=pl.BlockSpec((3 * A, tile_b), lambda i: (0, i)),  # lane-dense slab
        compiler_params=pltpu.CompilerParams(
            dimension_semantics=dimension_semantics,
            vmem_limit_bytes=vmem_limit),
    )(obs_t, w1c, b1, w2c, b2, whc, bh)

    mu = out_t[:A, :B].T
    std = out_t[A:2 * A, :B].T
    mean = out_t[2 * A:, :B].T
    return mu, std, mean


def _orthogonal(key, rows, cols, dtype=jnp.float32):
    """Deterministic orthogonal init (matches nn.init.orthogonal_ semantics)."""
    n = max(rows, cols)
    a = jax.random.normal(key, (n, min(rows, cols)), dtype=jnp.float32)
    q, r = jnp.linalg.qr(a)
    d = jnp.diag(r)
    q = q * jnp.where(d == 0, 1.0, jnp.sign(d))    # sign-fix (zero-safe)
    q = q[:rows, :cols] if rows >= cols else q[:cols, :rows].T
    return q.astype(dtype)


def init_params(key, obs_dim, hidden_dim, action_dim):
    """torch-layout params: Linear weights (out, in) orthogonal, biases zero."""
    k1, k2, k3 = jax.random.split(key, 3)
    w1 = _orthogonal(k1, hidden_dim, obs_dim)
    b1 = jnp.zeros((hidden_dim, 1), jnp.float32)
    w2 = _orthogonal(k2, hidden_dim, hidden_dim)
    b2 = jnp.zeros((hidden_dim, 1), jnp.float32)
    # Final layer fused: (2*action_dim, hidden); chunk(2, dim=-1) == row split.
    wh = _orthogonal(k3, 2 * action_dim, hidden_dim)
    bh = jnp.zeros((2 * action_dim, 1), jnp.float32)
    return (w1, b1, w2, b2, wh, bh)


def reference_forward(obs, params):
    """Pure-JAX reference of the torch forward (for sanity checking)."""
    w1, b1, w2, b2, wh, bh = params
    A = wh.shape[0] // 2
    h = jnp.maximum(obs @ w1.T + b1[:, 0], 0.0)
    h = jnp.maximum(h @ w2.T + b2[:, 0], 0.0)
    heads = h @ wh.T + bh[:, 0]
    mu, log_std = heads[:, :A], heads[:, A:]
    log_std = jnp.tanh(log_std)
    log_std = LOG_STD_MIN + 0.5 * (LOG_STD_MAX - LOG_STD_MIN) * (log_std + 1.0)
    return mu, jnp.exp(log_std), jnp.tanh(mu)


if __name__ == "__main__":
    obs_dim, action_dim, hidden_dim = 32, 4, 32
    batch = 8

    key = jax.random.PRNGKey(0)
    k_obs, k_params = jax.random.split(key)
    obs = jax.random.normal(k_obs, (batch, obs_dim), dtype=jnp.float32)
    params = init_params(k_params, obs_dim, hidden_dim, action_dim)

    # f32 path: must match the pure-JAX reference tightly.
    mu, std, pi_mean = diag_gaussian_actor(obs, params)
    jax.block_until_ready((mu, std, pi_mean))

    mu_ref, std_ref, mean_ref = reference_forward(obs, params)
    assert mu.shape == (batch, action_dim) and std.shape == (batch, action_dim)
    assert jnp.allclose(mu, mu_ref, rtol=1e-5, atol=1e-5), "mu mismatch"
    assert jnp.allclose(std, std_ref, rtol=1e-5, atol=1e-5), "std mismatch"
    assert jnp.allclose(pi_mean, mean_ref, rtol=1e-5, atol=1e-5), "mean mismatch"

    # bf16 matmul-input path (perf config for v6e/v7x): runs + stays close.
    mu_h, std_h, mean_h = diag_gaussian_actor(obs, params, param_dtype=jnp.bfloat16)
    jax.block_until_ready((mu_h, std_h, mean_h))
    finite = (jnp.all(jnp.isfinite(mu_h)) & jnp.all(jnp.isfinite(std_h))
              & jnp.all(jnp.isfinite(mean_h)))
    assert bool(finite), "bf16 path produced non-finite values"
    assert jnp.allclose(mu_h, mu_ref, rtol=0.2, atol=0.2), "bf16 mu drifted too far"

    print("KERNEL_OK")
</pallas_src>

<mosaic_0001>
module attributes {stable_mosaic.version = 11 : i64} {
  func.func @_actor_kernel(%arg0: i32, %arg1: memref<32x128xf32, #tpu.memory_space<vmem>>, %arg2: memref<32x32xf32, #tpu.memory_space<vmem>>, %arg3: memref<32x1xf32, #tpu.memory_space<vmem>>, %arg4: memref<32x32xf32, #tpu.memory_space<vmem>>, %arg5: memref<32x1xf32, #tpu.memory_space<vmem>>, %arg6: memref<8x32xf32, #tpu.memory_space<vmem>>, %arg7: memref<8x1xf32, #tpu.memory_space<vmem>>, %arg8: memref<12x128xf32, #tpu.memory_space<vmem>>) attributes {dimension_semantics = [#tpu.dimension_semantics<parallel>], iteration_bounds = array<i64: 1>, scalar_prefetch = 0 : i64, scratch_operands = 0 : i64, tpu.core_type = #tpu.core_type<tc>, window_params = [{transform_indices = @transform_0, window_bounds = array<i64: 32, 128>}, {pipeline_mode = #tpu.pipeline_mode<synchronous>, transform_indices = @transform_1, window_bounds = array<i64: 32, 32>}, {pipeline_mode = #tpu.pipeline_mode<synchronous>, transform_indices = @transform_2, window_bounds = array<i64: 32, 1>}, {pipeline_mode = #tpu.pipeline_mode<synchronous>, transform_indices = @transform_3, window_bounds = array<i64: 32, 32>}, {pipeline_mode = #tpu.pipeline_mode<synchronous>, transform_indices = @transform_4, window_bounds = array<i64: 32, 1>}, {pipeline_mode = #tpu.pipeline_mode<synchronous>, transform_indices = @transform_5, window_bounds = array<i64: 8, 32>}, {pipeline_mode = #tpu.pipeline_mode<synchronous>, transform_indices = @transform_6, window_bounds = array<i64: 8, 1>}, {transform_indices = @transform_7, window_bounds = array<i64: 12, 128>}]} {
    %c0 = arith.constant 0 : index
    %c0_0 = arith.constant 0 : index
    %0 = vector.load %arg1[%c0, %c0_0] : memref<32x128xf32, #tpu.memory_space<vmem>>, vector<32x128xf32>
    %c0_1 = arith.constant 0 : index
    %c0_2 = arith.constant 0 : index
    %1 = vector.load %arg2[%c0_1, %c0_2] : memref<32x32xf32, #tpu.memory_space<vmem>>, vector<32x32xf32>
    %cst = arith.constant dense<0.000000e+00> : vector<32x128xf32>
    %2 = tpu.matmul %1, %0, %cst {dimension_numbers = #tpu.dot_dimension_numbers<[1], [0], [0], [1], [0, 0, 1, 1], [], []>} : vector<32x32xf32>, vector<32x128xf32>, vector<32x128xf32> -> vector<32x128xf32>
    %c0_3 = arith.constant 0 : index
    %c0_4 = arith.constant 0 : index
    %3 = vector.load %arg3[%c0_3, %c0_4] : memref<32x1xf32, #tpu.memory_space<vmem>>, vector<32x1xf32>
    %4 = vector.broadcast %3 : vector<32x1xf32> to vector<32x128xf32>
    %5 = arith.addf %2, %4 : vector<32x128xf32>
    %cst_5 = arith.constant 0.000000e+00 : f32
    %6 = vector.broadcast %cst_5 : f32 to vector<32x128xf32>
    %7 = arith.maximumf %5, %6 : vector<32x128xf32>
    %c0_6 = arith.constant 0 : index
    %c0_7 = arith.constant 0 : index
    %8 = vector.load %arg4[%c0_6, %c0_7] : memref<32x32xf32, #tpu.memory_space<vmem>>, vector<32x32xf32>
    %cst_8 = arith.constant dense<0.000000e+00> : vector<32x128xf32>
    %9 = tpu.matmul %8, %7, %cst_8 {dimension_numbers = #tpu.dot_dimension_numbers<[1], [0], [0], [1], [0, 0, 1, 1], [], []>} : vector<32x32xf32>, vector<32x128xf32>, vector<32x128xf32> -> vector<32x128xf32>
    %c0_9 = arith.constant 0 : index
    %c0_10 = arith.constant 0 : index
    %10 = vector.load %arg5[%c0_9, %c0_10] : memref<32x1xf32, #tpu.memory_space<vmem>>, vector<32x1xf32>
    %11 = vector.broadcast %10 : vector<32x1xf32> to vector<32x128xf32>
    %12 = arith.addf %9, %11 : vector<32x128xf32>
    %cst_11 = arith.constant 0.000000e+00 : f32
    %13 = vector.broadcast %cst_11 : f32 to vector<32x128xf32>
    %14 = arith.maximumf %12, %13 : vector<32x128xf32>
    %c0_12 = arith.constant 0 : index
    %c0_13 = arith.constant 0 : index
    %15 = vector.load %arg6[%c0_12, %c0_13] : memref<8x32xf32, #tpu.memory_space<vmem>>, vector<8x32xf32>
    %cst_14 = arith.constant dense<0.000000e+00> : vector<8x128xf32>
    %16 = tpu.matmul %15, %14, %cst_14 {dimension_numbers = #tpu.dot_dimension_numbers<[1], [0], [0], [1], [0, 0, 1, 1], [], []>} : vector<8x32xf32>, vector<32x128xf32>, vector<8x128xf32> -> vector<8x128xf32>
    %c0_15 = arith.constant 0 : index
    %c0_16 = arith.constant 0 : index
    %17 = vector.load %arg7[%c0_15, %c0_16] : memref<8x1xf32, #tpu.memory_space<vmem>>, vector<8x1xf32>
    %18 = vector.broadcast %17 : vector<8x1xf32> to vector<8x128xf32>
    %19 = arith.addf %16, %18 : vector<8x128xf32>
    %20 = math.tanh %19 : vector<8x128xf32>
    %21 = vector.extract_strided_slice %19 {offsets = [0, 0], sizes = [4, 128], strides = [1, 1]} : vector<8x128xf32> to vector<4x128xf32>
    %22 = vector.extract_strided_slice %20 {offsets = [4, 0], sizes = [4, 128], strides = [1, 1]} : vector<8x128xf32> to vector<4x128xf32>
    %cst_17 = arith.constant 3.500000e+00 : f32
    %23 = vector.broadcast %cst_17 : f32 to vector<4x128xf32>
    %24 = arith.mulf %23, %22 : vector<4x128xf32>
    %cst_18 = arith.constant -1.500000e+00 : f32
    %25 = vector.broadcast %cst_18 : f32 to vector<4x128xf32>
    %26 = arith.addf %24, %25 : vector<4x128xf32>
    %27 = math.exp %26 : vector<4x128xf32>
    %28 = vector.extract_strided_slice %20 {offsets = [0, 0], sizes = [4, 128], strides = [1, 1]} : vector<8x128xf32> to vector<4x128xf32>
    %29 = tpu.concatenate %21, %27, %28 in 0 : vector<4x128xf32>, vector<4x128xf32>, vector<4x128xf32> -> vector<12x128xf32>
    %c0_19 = arith.constant 0 : index
    %c0_20 = arith.constant 0 : index
    %30 = vector.load %arg8[%c0_19, %c0_20] : memref<12x128xf32, #tpu.memory_space<vmem>>, vector<12x128xf32>
    tpu.vector_store %arg8[%c0_19, %c0_20], %29 {strides = array<i32>} : memref<12x128xf32, #tpu.memory_space<vmem>>, vector<12x128xf32>,
    return
  }
  func.func @transform_0(%arg0: i32) -> (i32, i32) {
    %c0_i32 = arith.constant 0 : i32
    %c0_i32_0 = arith.constant 0 : i32
    return %c0_i32, %arg0 : i32, i32
  }
  func.func @transform_1(%arg0: i32) -> (i32, i32) {
    %c0_i32 = arith.constant 0 : i32
    %c0_i32_0 = arith.constant 0 : i32
    %c0_i32_1 = arith.constant 0 : i32
    return %c0_i32, %c0_i32_0 : i32, i32
  }
  func.func @transform_2(%arg0: i32) -> (i32, i32) {
    %c0_i32 = arith.constant 0 : i32
    %c0_i32_0 = arith.constant 0 : i32
    %c0_i32_1 = arith.constant 0 : i32
    return %c0_i32, %c0_i32_0 : i32, i32
  }
  func.func @transform_3(%arg0: i32) -> (i32, i32) {
    %c0_i32 = arith.constant 0 : i32
    %c0_i32_0 = arith.constant 0 : i32
    %c0_i32_1 = arith.constant 0 : i32
    return %c0_i32, %c0_i32_0 : i32, i32
  }
  func.func @transform_4(%arg0: i32) -> (i32, i32) {
    %c0_i32 = arith.constant 0 : i32
    %c0_i32_0 = arith.constant 0 : i32
    %c0_i32_1 = arith.constant 0 : i32
    return %c0_i32, %c0_i32_0 : i32, i32
  }
  func.func @transform_5(%arg0: i32) -> (i32, i32) {
    %c0_i32 = arith.constant 0 : i32
    %c0_i32_0 = arith.constant 0 : i32
    %c0_i32_1 = arith.constant 0 : i32
    return %c0_i32, %c0_i32_0 : i32, i32
  }
  func.func @transform_6(%arg0: i32) -> (i32, i32) {
    %c0_i32 = arith.constant 0 : i32
    %c0_i32_0 = arith.constant 0 : i32
    %c0_i32_1 = arith.constant 0 : i32
    return %c0_i32, %c0_i32_0 : i32, i32
  }
  func.func @transform_7(%arg0: i32) -> (i32, i32) {
    %c0_i32 = arith.constant 0 : i32
    %c0_i32_0 = arith.constant 0 : i32
    return %c0_i32, %arg0 : i32, i32
  }
}

</mosaic_0001>

<bundles_post_ra>
// kernel: tpu_custom_call.1
= control target key start
LH: loop header
LB: loop body
LE: loop exit
PB: predicated region body
PF: predicated region fallthrough
CT: control target
= control target key end

     0   :  { %12 = vsyncpa [#allocation3], 0  ;;  %s704_s0 = inlined_call_operand.vmem [shape: f32[32,128], index: 0, kind: input, shape index: {}]   ;;  %s705_s1 = inlined_call_operand.vmem [shape: f32[32,32], index: 1, kind: input, shape index: {}]   ;;  %s706_s2 = inlined_call_operand.vmem [shape: f32[32,1], index: 2, kind: input, shape index: {}]   ;;  %s707_s3 = inlined_call_operand.hbm [shape: f32[32,32], index: 3, kind: input, shape index: {}]   ;;  %s708_s4 = inlined_call_operand.vmem [shape: f32[32,1], index: 4, kind: input, shape index: {}]   ;;  %s709_s5 = inlined_call_operand.vmem [shape: f32[8,32], index: 5, kind: input, shape index: {}]   ;;  %s710_s6 = inlined_call_operand.vmem [shape: f32[8,1], index: 6, kind: input, shape index: {}]   ;;  %s711_s7 = inlined_call_operand.hbm [shape: f32[12,128], index: 7, kind: output, shape index: {}]  }
   0x1   :  { %13 = vsyncpa [#allocation4], 0  ;;  %s563_s24 = smov [#allocation2]   ;;  %s515_s28 = scalar_lea.hbm %s707_s3, 512 }
   0x2   :  { %s25_s25 = sshll.u32 %s563_s24, 4  ;;  %p516_p0 = scmp.ne.s32.totalorder %s707_s3, %s515_s28  ;;  %s26_s25 = int_to_ptr.vmem [resolvable:$true] %s25_s25 }
   0x3   :  { %p519_p1 = scmp.lt.u32.totalorder %s515_s28, %s707_s3 }
   0x5   :  { %p521_p2 = pnand %p519_p1, %p516_p0 }
   0x7   :  { %524 = shalt.err (!%p521_p2)
}
   0x8   :  { %s525_s10 = scalar_lea.vmem %s26_s25, 512  ;;  %p530_p4 = scmp.lt.s32.totalorder %s26_s25, %s26_s25 }
   0x9   :  { %p526_p3 = scmp.ne.s32.totalorder %s26_s25, %s525_s10  ;;  %p531_p5 = scmp.lt.s32.totalorder %s525_s10, %s525_s10 }
   0xb   :  { %p532_p6 = por %p531_p5, %p530_p4 }
   0xd   :  { %p533_p7 = pnand %p532_p6, %p526_p3 }
   0xf   :  { %536 = shalt.err (!%p533_p7)
}
  0x10   :  { %s564_s11 = smov 128   ;;  %s565_s12 = smov 8  }
  0x11   :  { %31 = dma.hbm_to_vmem [thread:$0]  %s707_s3, 512, %s26_s25, [#allocation3], %s564_s11, %s564_s11, %s565_s12  }
  0x12   :  { %559 = dma.done.wait [#allocation3], 512  }
  0x13   :  { %560 = vsyncadd [#allocation3], 4294966784  ;;  %v566_v0 = vmov 0   ;;  %vm73_vm0 = vcmask 261120   ;;  %v41_v1 = vld [vmem:[%s704_s0] sm:$0xff]  ;;  %v42_v2 = vld [vmem:[%s704_s0 + $0x8] sm:$0xff] }
  0x14   :  { %509 = vset.pattern.permute.xlu0 %v566_v0  ;;  %510 = vset.pattern.permute.xlu1 %v566_v0  ;;  %v43_v3 = vld [vmem:[%s704_s0 + $0x10] sm:$0xff]  ;;  %v479_v4 = vpack.c.bf16 %v42_v2, %v41_v1  ;;  %v44_v5 = vld [vmem:[%s704_s0 + $0x18] sm:$0xff]  ;;  %v45_v6 = vld [vmem:[%s705_s1] sm:$0xff]  ;;  %v567_v42 = vmov 0.0|0.0   ;;  %vm568_vm1 = vmmov 0   ;;  %v569_v43 = vmov 0.0  }
  0x15   :  { %v483_v7 = vpack.c.bf16 %v44_v5, %v43_v3  ;;  %448 = vmatprep.mubr.msk.f32.mxu0 %vm73_vm0, %v45_v6  ;;  %v49_v8 = vld [vmem:[%s706_s2] sm:$0xff]  ;;  %v51_v9 = vld [vmem:[%s706_s2 + $0x10] sm:$0xff]  ;;  %v50_v10 = vld [vmem:[%s706_s2 + $0x8] sm:$0xff]  ;;  %vm389_vm2 = vcmask 1043456  }
  0x16   :  { %480 = vmatprep.subr.bf16.mxu0 %v479_v4  ;;  %55 = vperm.xlu0 %509, %v49_v8   ;;  %v52_v11 = vld [vmem:[%s706_s2 + $0x18] sm:$0xff]  ;;  %v46_v12 = vld [vmem:[%s705_s1 + $0x8] sm:$0xff]  ;;  %v179_v13 = vld [vmem:[%s708_s4] sm:$0xff] }
  0x17   :  { %482 = vmatpush3.bf16.msra.mxu0 %v479_v4  ;;  %65 = vperm.xlu1 %510, %v51_v9   ;;  %v47_v14 = vld [vmem:[%s705_s1 + $0x10] sm:$0xff]  ;;  %v180_v15 = vld [vmem:[%s708_s4 + $0x8] sm:$0xff]  ;;  %v48_v16 = vld [vmem:[%s705_s1 + $0x18] sm:$0xff] }
  0x18   :  { %484 = vmatprep.subr.bf16.mxu0 %v483_v7  ;;  %v181_v17 = vld [vmem:[%s708_s4 + $0x10] sm:$0xff]  ;;  %v182_v18 = vld [vmem:[%s708_s4 + $0x18] sm:$0xff]  ;;  %v305_v19 = vld [vmem:[%s710_s6] sm:$0xff]  ;;  %s570_s6 = smov [#allocation5]  }
  0x19   :  { %v175_v20 = vld [vmem:[#allocation2] sm:$0xff]  ;;  %v176_v39 = vld [vmem:[#allocation2 + $0x8] sm:$0xff]  ;;  %v177_v40 = vld [vmem:[#allocation2 + $0x10] sm:$0xff]  ;;  %s398_s24 = sshll.u32 %s570_s6, 4  ;;  %s399_s24 = int_to_ptr.vmem [resolvable:$true] %s398_s24 }
  0x1a   :  { %60 = vperm.xlu0 %509, %v50_v10   ;;  %462 = vmatprep.mubr.msk.f32.mxu1 %vm73_vm0, %v175_v20  ;;  %v178_v41 = vld [vmem:[#allocation2 + $0x18] sm:$0xff]  ;;  %v304_v62 = vld [vmem:[%s709_s5] sm:$0xff]  ;;  %s537_s5 = scalar_lea.vmem %s399_s24, 256  ;;  %p542_p9 = scmp.lt.s32.totalorder %s399_s24, %s399_s24 }
  0x1b   :  { %486 = vmatpush3.bf16.msra.mxu0 %v483_v7  ;;  %70 = vperm.xlu1 %510, %v52_v11   ;;  %p538_p8 = scmp.ne.s32.totalorder %s399_s24, %s537_s5  ;;  %p543_p10 = scmp.lt.s32.totalorder %s537_s5, %s537_s5 }
  0x1c   :  { %495 = vmatprep.subr.bf16.mxu0 %v567_v42 }
  0x1d   :  { %p544_p11 = por %p543_p10, %p542_p9 }
  0x1e   :  { %449 = vmatmul.mubr.msk.f32.vlgmr.msra.gmra.mrb[0].mxu0 %vm73_vm0, %v46_v12  ;;  %185 = vperm.xlu0 %509, %v179_v13  }
  0x1f   :  { %451 = vmatprep.mubr.msk.f32.mxu0 %vm73_vm0, %v47_v14  ;;  %190 = vperm.xlu1 %510, %v180_v15   ;;  %p545_p12 = pnand %p544_p11, %p538_p8 }
  0x22   :  { %452 = vmatmul.mubr.msk.f32.gmra.mrb[2].mxu0 %vm73_vm0, %v48_v16  ;;  %195 = vperm.xlu0 %509, %v181_v17  }
  0x23   :  { %200 = vperm.xlu1 %510, %v182_v18   ;;  %476 = vmatprep.mubr.msk.f32.mxu0 %vm568_vm1, %v569_v43 }
  0x26   :  { %308 = vperm.xlu0 %509, %v305_v19  }
  0x95   :  { %v56_v21 = vpop.permute.xlu0 %55 }
  0x96   :  { %v66_v22 = vpop.permute.xlu1 %65 }
  0x99   :  { %v61_v23 = vpop.permute.xlu0 %60 }
  0x9a   :  { %v71_v29 = vpop.permute.xlu1 %70 }
  0x9d   :  { %v186_v45 = vpop.permute.xlu0 %185 }
  0x9e   :  { %v191_v44 = vpop.permute.xlu1 %190 }
  0xa1   :  { %v196_v54 = vpop.permute.xlu0 %195 }
  0xa2   :  { %v201_v51 = vpop.permute.xlu1 %200 }
  0xa5   :  { %v309_v63 = vpop.permute.xlu0 %308 }
  0xf1   :  { %v450_v24 = vpop.f32.mrb[0].mxu0 }
  0xf2   :  { %v158_v25 = vadd.f32 %v450_v24, %v61_v23  ;;  %v152_v26 = vpop.f32.mrb[1].mxu0 }
  0xf3   :  { %v153_v27 = vadd.f32 %v152_v26, %v56_v21 }
  0xf4   :  { %v172_v28 = vmax.f32 %v158_v25, 0.0 }
  0xf5   :  { %v171_v30 = vmax.f32 %v153_v27, 0.0  ;;  %v453_v31 = vpop.f32.mrb[2].mxu0 }
  0xf6   :  { %v168_v32 = vadd.f32 %v453_v31, %v71_v29  ;;  %v162_v33 = vpop.f32.mrb[3].mxu0 }
  0xf7   :  { %v163_v34 = vadd.f32 %v162_v33, %v66_v22  ;;  %v487_v35 = vpack.c.bf16 %v172_v28, %v171_v30 }
  0xf8   :  { %v174_v36 = vmax.f32 %v168_v32, 0.0 }
  0xf9   :  { %v173_v37 = vmax.f32 %v163_v34, 0.0  ;;  %488 = vmatprep.subr.bf16.mxu1 %v487_v35 }
  0xfa   :  { %490 = vmatpush3.bf16.msra.mxu1 %v487_v35 }
  0xfb   :  { %v491_v38 = vpack.c.bf16 %v174_v36, %v173_v37 }
  0xfd   :  { %492 = vmatprep.subr.bf16.mxu1 %v491_v38 }
  0xfe   :  { %494 = vmatpush3.bf16.msra.mxu1 %v491_v38 }
 0x101   :  { %463 = vmatmul.mubr.msk.f32.vlgmr.msra.gmra.mrb[0].mxu1 %vm73_vm0, %v176_v39 }
 0x102   :  { %465 = vmatprep.mubr.msk.f32.mxu1 %vm73_vm0, %v177_v40 }
 0x105   :  { %466 = vmatmul.mubr.msk.f32.gmra.mrb[2].mxu1 %vm73_vm0, %v178_v41 }
 0x1d4   :  { %v464_v46 = vpop.f32.mrb[0].mxu1 }
 0x1d5   :  { %v287_v47 = vadd.f32 %v464_v46, %v191_v44  ;;  %v281_v48 = vpop.f32.mrb[1].mxu1 }
 0x1d6   :  { %v282_v49 = vadd.f32 %v281_v48, %v186_v45 }
 0x1d7   :  { %v301_v50 = vmax.f32 %v287_v47, 0.0 }
 0x1d8   :  { %v300_v52 = vmax.f32 %v282_v49, 0.0  ;;  %v467_v53 = vpop.f32.mrb[2].mxu1 }
 0x1d9   :  { %v297_v55 = vadd.f32 %v467_v53, %v201_v51  ;;  %v291_v56 = vpop.f32.mrb[3].mxu1 }
 0x1da   :  { %v496_v57 = vpack.c.bf16 %v301_v50, %v300_v52  ;;  %v292_v58 = vadd.f32 %v291_v56, %v196_v54 }
 0x1db   :  { %v303_v59 = vmax.f32 %v297_v55, 0.0 }
 0x1dc   :  { %v302_v60 = vmax.f32 %v292_v58, 0.0  ;;  %497 = vmatpush3.bf16.msra.mxu0 %v496_v57 }
 0x1dd   :  { %498 = vmatprep.subr.bf16.mxu0 %v567_v42 }
 0x1de   :  { %v499_v61 = vpack.c.bf16 %v303_v59, %v302_v60 }
 0x1e0   :  { %500 = vmatpush3.bf16.msra.mxu0 %v499_v61 }
 0x1e3   :  { %477 = vmatmul.mubr.msk.f32.vlgmr.msra.gmra.mrb[4].mxu0 %vm73_vm0, %v304_v62 }
 0x2b6   :  { %v380_v0 = vpop.f32.mrb[4].mxu0 }
 0x2b7   :  { %v381_v1 = vadd.f32 %v380_v0, %v309_v63  ;;  %v478_v2 = vpop.f32.mrb[5].mxu0 }
 0x2b9   :  { %511 = vtanh.f32 %v381_v1 }
 0x2c3   :  { %v512_v3 = vpop.eup %511 }
 0x2c4   :  { %v385_v4 = vmul.f32 3.5, %v512_v3  ;;  %392 = vst [vmem:[#allocation5 + $0x8] sm:$0xf] %v512_v3 }
 0x2c6   :  { %v386_v5 = vadd.f32 -1.5, %v385_v4 }
 0x2c8   :  { %v387_v6 = vmul.f32 1.442695, %v386_v5 }
 0x2ca   :  { %513 = vpow2.f32 %v387_v6 }
 0x2d4   :  { %v514_v7 = vpop.eup %513 }
 0x2d5   :  { %v390_v8 = vsel %vm389_vm2, %v381_v1, %v514_v7 }
 0x2d6   :  { %391 = vst [vmem:[#allocation5] sm:$0xff] %v390_v8 }
 0x2d7   :  { %548 = shalt.err (!%p545_p12)
}
 0x2d8   :  { %s549_s27 = scalar_lea.hbm %s711_s7, 256 }
 0x2d9   :  { %p550_p13 = scmp.ne.s32.totalorder %s711_s7, %s549_s27  ;;  %p553_p0 = scmp.lt.u32.totalorder %s549_s27, %s711_s7 }
 0x2db   :  { %p555_p1 = pnand %p553_p0, %p550_p13 }
 0x2dd   :  { %558 = shalt.err (!%p555_p1)
}
 0x2de   :  { %404 = dma.vmem_to_hbm [thread:$0]  %s399_s24, 256, %s711_s7, [#allocation4], %s564_s11, %s564_s11, %s565_s12  }
 0x2df   :  { %561 = dma.done.wait [#allocation4], 256  }
 0x2e0   :  { %562 = vsyncadd [#allocation4], 4294967040 }
 0x2e1   :  { %408 = vsyncpa [#allocation3], 1 }
 0x2e2   :  { %409 = vsyncpa [#allocation4], 1 }

</bundles_post_ra>
